<compile_context>
chip_gen: v5e
topology: v5e:2x2
jax: 0.10.0
libtpu: 0.0.40
codegen_flags: <defaults>
</compile_context>

<pallas_src>
import functools
import math

import jax
import jax.numpy as jnp
from jax.experimental import pallas as pl
from jax.experimental.pallas import tpu as pltpu


def _round_up(x, m):
    return (x + m - 1) // m * m


def _equal_linear_kernel(x_ref, wt_ref, b_ref, o_ref, acc_ref, *, lr_mul):
    # x_ref: (TM, TK)  wt_ref: (TK, TN)  b_ref: (1, TN) [already * lr_mul]
    # o_ref: (TM, TN)  acc_ref: (TM, TN) f32 scratch
    k = pl.program_id(2)

    @pl.when(k == 0)
    def _():
        acc_ref[...] = jnp.zeros_like(acc_ref)

    acc_ref[...] += jax.lax.dot_general(
        x_ref[...], wt_ref[...],
        dimension_numbers=(((1,), (0,)), ((), ())),   # (TM,TK)@(TK,TN)
        preferred_element_type=jnp.float32,
    )

    @pl.when(k == pl.num_programs(2) - 1)
    def _():
        # Epilogue on the small accumulator tile only (lr_mul folded here).
        o_ref[...] = (lr_mul * acc_ref[...] + b_ref[...]).astype(o_ref.dtype)


def _equal_linear_kernel_nobias(x_ref, wt_ref, o_ref, acc_ref, *, lr_mul):
    k = pl.program_id(2)

    @pl.when(k == 0)
    def _():
        acc_ref[...] = jnp.zeros_like(acc_ref)

    acc_ref[...] += jax.lax.dot_general(
        x_ref[...], wt_ref[...],
        dimension_numbers=(((1,), (0,)), ((), ())),
        preferred_element_type=jnp.float32,
    )

    @pl.when(k == pl.num_programs(2) - 1)
    def _():
        o_ref[...] = (lr_mul * acc_ref[...]).astype(o_ref.dtype)


def equal_linear(x, weight, bias, lr_mul=0.1, *,
                 tm=256, tn=256, tk=2048, compute_dtype=None):
    """Pallas implementation of EqualLinear.forward.

    x: (..., fin); weight: (fout, fin); bias: (fout,) or None.
    Returns (..., fout) in x.dtype.
    """
    fout, fin = weight.shape
    orig_shape = x.shape
    x2d = x.reshape(-1, fin)
    batch = x2d.shape[0]
    out_dtype = x.dtype

    # Tile sizes: multiples of (8, 128); fin stays un-tiled unless > tk.
    TM = min(tm, _round_up(batch, 8))
    TN = min(tn, _round_up(fout, 128))
    TK = min(tk, _round_up(fin, 128))

    Mp = _round_up(batch, TM)
    Np = _round_up(fout, TN)
    Kp = _round_up(fin, TK)

    # Pre-transpose weight once in the wrapper: (fin, fout) so the MXU
    # contraction is (B,fin)@(fin,fout) with a lane-dense output.
    w_t = weight.T

    if compute_dtype is not None:
        x2d = x2d.astype(compute_dtype)
        w_t = w_t.astype(compute_dtype)

    # Zero-pad to tile-aligned shapes (zeros contribute nothing to the dot).
    x_p = jnp.pad(x2d, ((0, Mp - batch), (0, Kp - fin)))
    w_p = jnp.pad(w_t, ((0, Kp - fin), (0, Np - fout)))

    grid = (Mp // TM, Np // TN, Kp // TK)

    x_spec = pl.BlockSpec((TM, TK), lambda i, j, k: (i, k))
    w_spec = pl.BlockSpec((TK, TN), lambda i, j, k: (k, j))
    o_spec = pl.BlockSpec((TM, TN), lambda i, j, k: (i, j))

    common = dict(
        out_shape=jax.ShapeDtypeStruct((Mp, Np), out_dtype),
        grid=grid,
        out_specs=o_spec,
        scratch_shapes=[pltpu.VMEM((TM, TN), jnp.float32)],
        compiler_params=pltpu.CompilerParams(
            dimension_semantics=("parallel", "parallel", "arbitrary")),
    )

    if bias is not None:
        # Pre-scale bias by lr_mul once in the wrapper (f32 epilogue).
        b_p = jnp.pad((bias.astype(jnp.float32) * lr_mul).reshape(1, fout),
                      ((0, 0), (0, Np - fout)))
        b_spec = pl.BlockSpec((1, TN), lambda i, j, k: (0, j))
        out = pl.pallas_call(
            functools.partial(_equal_linear_kernel, lr_mul=lr_mul),
            in_specs=[x_spec, w_spec, b_spec],
            **common,
        )(x_p, w_p, b_p)
    else:
        out = pl.pallas_call(
            functools.partial(_equal_linear_kernel_nobias, lr_mul=lr_mul),
            in_specs=[x_spec, w_spec],
            **common,
        )(x_p, w_p)

    return out[:batch, :fout].reshape(*orig_shape[:-1], fout)


def init_equal_linear_params(key, fin, fout, lr_mul=0.1, bias=True):
    """Deterministic init mirroring EqualLinear.reset_parameters()."""
    kw, kb = jax.random.split(key)
    # kaiming_uniform_(weight, a=sqrt(5)/lr_mul), fan_in = fin
    a = math.sqrt(5) / lr_mul
    gain = math.sqrt(2.0 / (1.0 + a * a))
    w_bound = math.sqrt(3.0) * gain / math.sqrt(fin)
    weight = jax.random.uniform(kw, (fout, fin), jnp.float32, -w_bound, w_bound)
    if bias:
        b_bound = 1.0 / (math.sqrt(fin) * lr_mul)
        b = jax.random.uniform(kb, (fout,), jnp.float32, -b_bound, b_bound)
    else:
        b = None
    return weight, b


if __name__ == "__main__":
    key = jax.random.PRNGKey(0)
    k_x, k_p = jax.random.split(key)

    fin, fout = 32, 64
    lr_mul = 0.1

    # Leading dims exercise the (..., fin) -> flatten path.
    x = jax.random.normal(k_x, (2, 4, fin), dtype=jnp.float32)
    weight, bias = init_equal_linear_params(k_p, fin, fout, lr_mul=lr_mul, bias=True)

    # Bias path
    y = equal_linear(x, weight, bias, lr_mul=lr_mul)
    y = jax.block_until_ready(y)
    y_ref = x @ (weight * lr_mul).T + bias * lr_mul
    assert y.shape == (2, 4, fout)
    assert jnp.allclose(y, y_ref, atol=1e-5, rtol=1e-5), "mismatch vs reference (bias)"

    # No-bias path
    y2 = equal_linear(x, weight, None, lr_mul=lr_mul)
    y2 = jax.block_until_ready(y2)
    y2_ref = x @ (weight * lr_mul).T
    assert jnp.allclose(y2, y2_ref, atol=1e-5, rtol=1e-5), "mismatch vs reference (no bias)"

    print("KERNEL_OK")
</pallas_src>

<mosaic_0001>
module attributes {stable_mosaic.version = 11 : i64} {
  func.func @_equal_linear_kernel(%arg0: i32, %arg1: i32, %arg2: i32, %arg3: memref<8x128xf32, #tpu.memory_space<vmem>>, %arg4: memref<128x128xf32, #tpu.memory_space<vmem>>, %arg5: memref<1x128xf32, #tpu.memory_space<vmem>>, %arg6: memref<8x128xf32, #tpu.memory_space<vmem>>, %arg7: memref<8x128xf32, #tpu.memory_space<vmem>>) attributes {dimension_semantics = [#tpu.dimension_semantics<parallel>, #tpu.dimension_semantics<parallel>, #tpu.dimension_semantics<arbitrary>], iteration_bounds = array<i64: 1, 1, 1>, scalar_prefetch = 0 : i64, scratch_operands = 1 : i64, tpu.core_type = #tpu.core_type<tc>, window_params = [{transform_indices = @transform_0, window_bounds = array<i64: 8, 128>}, {transform_indices = @transform_1, window_bounds = array<i64: 128, 128>}, {transform_indices = @transform_2, window_bounds = array<i64: 1, 128>}, {transform_indices = @transform_3, window_bounds = array<i64: 8, 128>}]} {
    %c0_i32 = arith.constant 0 : i32
    %0 = arith.cmpi eq, %arg2, %c0_i32 : i32
    %1 = arith.extui %0 : i1 to i32
    %c0_i32_0 = arith.constant 0 : i32
    %2 = arith.cmpi ne, %1, %c0_i32_0 : i32
    scf.if %2 {
      %cst_10 = arith.constant 0.000000e+00 : f32
      %12 = vector.broadcast %cst_10 : f32 to vector<8x128xf32>
      %c0_11 = arith.constant 0 : index
      %c0_12 = arith.constant 0 : index
      %13 = vector.load %arg7[%c0_11, %c0_12] : memref<8x128xf32, #tpu.memory_space<vmem>>, vector<8x128xf32>
      tpu.vector_store %arg7[%c0_11, %c0_12], %12 {strides = array<i32>} : memref<8x128xf32, #tpu.memory_space<vmem>>, vector<8x128xf32>,
    } else {
    }
    %c0 = arith.constant 0 : index
    %c0_1 = arith.constant 0 : index
    %3 = vector.load %arg7[%c0, %c0_1] : memref<8x128xf32, #tpu.memory_space<vmem>>, vector<8x128xf32>
    %c0_2 = arith.constant 0 : index
    %c0_3 = arith.constant 0 : index
    %4 = vector.load %arg3[%c0_2, %c0_3] : memref<8x128xf32, #tpu.memory_space<vmem>>, vector<8x128xf32>
    %c0_4 = arith.constant 0 : index
    %c0_5 = arith.constant 0 : index
    %5 = vector.load %arg4[%c0_4, %c0_5] : memref<128x128xf32, #tpu.memory_space<vmem>>, vector<128x128xf32>
    %cst = arith.constant dense<0.000000e+00> : vector<8x128xf32>
    %6 = tpu.matmul %4, %5, %cst {dimension_numbers = #tpu.dot_dimension_numbers<[1], [0], [0], [1], [0, 0, 1, 1], [], []>} : vector<8x128xf32>, vector<128x128xf32>, vector<8x128xf32> -> vector<8x128xf32>
    %7 = arith.addf %3, %6 : vector<8x128xf32>
    %c0_6 = arith.constant 0 : index
    %c0_7 = arith.constant 0 : index
    %8 = vector.load %arg7[%c0_6, %c0_7] : memref<8x128xf32, #tpu.memory_space<vmem>>, vector<8x128xf32>
    tpu.vector_store %arg7[%c0_6, %c0_7], %7 {strides = array<i32>} : memref<8x128xf32, #tpu.memory_space<vmem>>, vector<8x128xf32>,
    %c0_i32_8 = arith.constant 0 : i32
    %9 = arith.cmpi eq, %arg2, %c0_i32_8 : i32
    %10 = arith.extui %9 : i1 to i32
    %c0_i32_9 = arith.constant 0 : i32
    %11 = arith.cmpi ne, %10, %c0_i32_9 : i32
    scf.if %11 {
      %c0_10 = arith.constant 0 : index
      %c0_11 = arith.constant 0 : index
      %12 = vector.load %arg7[%c0_10, %c0_11] : memref<8x128xf32, #tpu.memory_space<vmem>>, vector<8x128xf32>
      %cst_12 = arith.constant 1.000000e-01 : f32
      %13 = vector.broadcast %cst_12 : f32 to vector<8x128xf32>
      %14 = arith.mulf %13, %12 : vector<8x128xf32>
      %c0_13 = arith.constant 0 : index
      %c0_14 = arith.constant 0 : index
      %15 = vector.load %arg5[%c0_13, %c0_14] : memref<1x128xf32, #tpu.memory_space<vmem>>, vector<1x128xf32>
      %16 = vector.broadcast %15 : vector<1x128xf32> to vector<8x128xf32>
      %17 = arith.addf %14, %16 : vector<8x128xf32>
      %c0_15 = arith.constant 0 : index
      %c0_16 = arith.constant 0 : index
      %18 = vector.load %arg6[%c0_15, %c0_16] : memref<8x128xf32, #tpu.memory_space<vmem>>, vector<8x128xf32>
      tpu.vector_store %arg6[%c0_15, %c0_16], %17 {strides = array<i32>} : memref<8x128xf32, #tpu.memory_space<vmem>>, vector<8x128xf32>,
    } else {
    }
    return
  }
  func.func @transform_0(%arg0: i32, %arg1: i32, %arg2: i32) -> (i32, i32) {
    %c0_i32 = arith.constant 0 : i32
    return %arg0, %arg2 : i32, i32
  }
  func.func @transform_1(%arg0: i32, %arg1: i32, %arg2: i32) -> (i32, i32) {
    %c0_i32 = arith.constant 0 : i32
    return %arg2, %arg1 : i32, i32
  }
  func.func @transform_2(%arg0: i32, %arg1: i32, %arg2: i32) -> (i32, i32) {
    %c0_i32 = arith.constant 0 : i32
    %c0_i32_0 = arith.constant 0 : i32
    return %c0_i32, %arg1 : i32, i32
  }
  func.func @transform_3(%arg0: i32, %arg1: i32, %arg2: i32) -> (i32, i32) {
    %c0_i32 = arith.constant 0 : i32
    return %arg0, %arg1 : i32, i32
  }
}

</mosaic_0001>

<bundles_post_ra>
// kernel: tpu_custom_call.1
= control target key start
LH: loop header
LB: loop body
LE: loop exit
PB: predicated region body
PF: predicated region fallthrough
CT: control target
= control target key end

     0   :  { %8 = vsyncpa [#allocation4], 0  ;;  %s240_s0 = inlined_call_operand.hbm [shape: f32[8,128], index: 0, kind: input, shape index: {}]   ;;  %s241_s1 = inlined_call_operand.hbm [shape: f32[128,128], index: 1, kind: input, shape index: {}]   ;;  %s242_s2 = inlined_call_operand.vmem [shape: f32[1,128], index: 2, kind: input, shape index: {}]   ;;  %s243_s3 = inlined_call_operand.hbm [shape: f32[8,128], index: 3, kind: output, shape index: {}]  }
   0x1   :  { %9 = vsyncpa [#allocation7], 0 }
   0x2   :  { %10 = vsyncpa [#allocation5], 0  ;;  %s16_s14 = sshll.u32 %s240_s0, 4  ;;  %s203_s15 = smov [#allocation3]   ;;  %s17_s14 = int_to_ptr.hbm [resolvable:$true] %s16_s14 }
   0x3   :  { %s18_s16 = sshll.u32 %s203_s15, 4  ;;  %s26_s19 = sshll.u32 %s241_s1, 4  ;;  %s19_s16 = int_to_ptr.vmem [resolvable:$true] %s18_s16  ;;  %s27_s19 = int_to_ptr.hbm [resolvable:$true] %s26_s19 }
   0x4   :  { %21 = dma.hbm_to_vmem [thread:$0]  %s17_s14, 128, %s19_s16, [#allocation4]  }
   0x5   :  { %s204_s20 = smov [#allocation6]   ;;  %s205_s22 = smov 128  }
   0x6   :  { %s28_s21 = sshll.u32 %s204_s20, 4  ;;  %s206_s23 = smov 8   ;;  %s29_s21 = int_to_ptr.vmem [resolvable:$true] %s28_s21 }
   0x7   :  { %34 = dma.hbm_to_vmem [thread:$0]  %s27_s19, 2048, %s29_s21, [#allocation7], %s205_s22, %s205_s22, %s206_s23  }
   0x8   :  { %197 = dma.done.wait [#allocation4], 128  }
   0x9   :  { %198 = vsyncadd [#allocation4], 4294967168 }
   0xa   :  { %199 = dma.done.wait [#allocation7], 2048  }
   0xb   :  { %200 = vsyncadd [#allocation7], 4294965248  ;;  %v67_v0 = vld [vmem:[#allocation6 + $0x78] sm:$0xff]  ;;  %v66_v1 = vld [vmem:[#allocation6 + $0x70] sm:$0xff]  ;;  %s207_s24 = smov [#allocation8]   ;;  %s108_s28 = sshll.u32 %s243_s3, 4  ;;  %s109_s28 = int_to_ptr.hbm [resolvable:$true] %s108_s28 }
   0xc   :  { %68 = vmatpush.msra.mxu0 %v67_v0  ;;  %v65_v2 = vld [vmem:[#allocation6 + $0x68] sm:$0xff]  ;;  %v64_v3 = vld [vmem:[#allocation6 + $0x60] sm:$0xff]  ;;  %v63_v4 = vld [vmem:[#allocation6 + $0x58] sm:$0xff]  ;;  %s106_s25 = sshll.u32 %s207_s24, 4  ;;  %s107_s25 = int_to_ptr.vmem [resolvable:$true] %s106_s25 }
   0xd   :  { %v62_v5 = vld [vmem:[#allocation6 + $0x50] sm:$0xff]  ;;  %v61_v6 = vld [vmem:[#allocation6 + $0x48] sm:$0xff]  ;;  %v60_v7 = vld [vmem:[#allocation6 + $0x40] sm:$0xff] }
   0xe   :  { %69 = vmatpush.msra.mxu0 %v66_v1  ;;  %v59_v8 = vld [vmem:[#allocation6 + $0x38] sm:$0xff]  ;;  %v58_v9 = vld [vmem:[#allocation6 + $0x30] sm:$0xff]  ;;  %v57_v10 = vld [vmem:[#allocation6 + $0x28] sm:$0xff] }
   0xf   :  { %v56_v11 = vld [vmem:[#allocation6 + $0x20] sm:$0xff]  ;;  %v55_v12 = vld [vmem:[#allocation6 + $0x18] sm:$0xff]  ;;  %v54_v13 = vld [vmem:[#allocation6 + $0x10] sm:$0xff] }
  0x10   :  { %70 = vmatpush.msra.mxu0 %v65_v2  ;;  %v53_v14 = vld [vmem:[#allocation6 + $0x8] sm:$0xff]  ;;  %v52_v15 = vld [vmem:[#allocation6] sm:$0xff]  ;;  %v51_v16 = vld [vmem:[#allocation3] sm:$0xff] }
  0x11   :  { %v124_v17 = vld [vmem:[%s242_s2] ss:$0 sm:$0xff] }
  0x12   :  { %71 = vmatpush.msra.mxu0 %v64_v3 }
  0x14   :  { %72 = vmatpush.msra.mxu0 %v63_v4 }
  0x16   :  { %73 = vmatpush.msra.mxu0 %v62_v5 }
  0x18   :  { %74 = vmatpush.msra.mxu0 %v61_v6 }
  0x1a   :  { %75 = vmatpush.msra.mxu0 %v60_v7 }
  0x1c   :  { %76 = vmatpush.msra.mxu0 %v59_v8 }
  0x1e   :  { %77 = vmatpush.msra.mxu0 %v58_v9 }
  0x20   :  { %78 = vmatpush.msra.mxu0 %v57_v10 }
  0x22   :  { %79 = vmatpush.msra.mxu0 %v56_v11 }
  0x24   :  { %80 = vmatpush.msra.mxu0 %v55_v12 }
  0x26   :  { %81 = vmatpush.msra.mxu0 %v54_v13 }
  0x28   :  { %82 = vmatpush.msra.mxu0 %v53_v14 }
  0x2a   :  { %83 = vmatpush.msra.mxu0 %v52_v15 }
  0x2b   :  { %84 = vmatmul.f32.vlgmr.msra.gmra.mxu0 %v51_v16 }
  0xa8   :  { %v85_v18 = vpop.f32.mrf.mxu0 }
  0xa9   :  { %v94_v19 = vmul.f32 0.1, %v85_v18 }
  0xab   :  { %v99_v20 = vadd.f32 %v124_v17, %v94_v19 }
  0xad   :  { %100 = vst [vmem:[#allocation8] sm:$0xff] %v99_v20 }
  0xae   :  { %111 = dma.vmem_to_hbm [thread:$0]  %s107_s25, 128, %s109_s28, [#allocation5]  }
  0xaf   :  { %201 = dma.done.wait [#allocation5], 128  }
  0xb0   :  { %202 = vsyncadd [#allocation5], 4294967168 }
  0xb1   :  { %116 = vsyncpa [#allocation4], 1 }
  0xb2   :  { %117 = vsyncpa [#allocation7], 1 }
  0xb3   :  { %118 = vsyncpa [#allocation5], 1 }

</bundles_post_ra>
